<compile_context>
chip_gen: v5e
topology: v5e:2x2
jax: 0.10.0
libtpu: 0.0.40
codegen_flags: <defaults>
</compile_context>

<pallas_src>
import numpy as np
import jax
import jax.numpy as jnp
from jax.experimental import pallas as pl
from jax.experimental.pallas import tpu as pltpu


def _round_up(x, m):
    return ((x + m - 1) // m) * m


def _make_kernel(num_rgap, num_sgap, num_pcount):
    ntotal = num_rgap + num_sgap + num_pcount
    off_s = num_rgap
    off_p = num_rgap + num_sgap

    def kernel(rg_ref, sg_ref, pc_ref, vt_ref, w_ref, theta_ref, ct_ref):
        tile_n = vt_ref.shape[0]

        rg = rg_ref[...]                 # (tile_n, 1) int32
        sg = sg_ref[...] + off_s         # fold concat offsets into the index
        pc = pc_ref[...] + off_p

        # one iota over the full concat width; ct lands directly in its final
        # lane layout (no concatenate / lane shifts).
        iota = jax.lax.broadcasted_iota(jnp.int32, (tile_n, ntotal), 1)
        ct = ((iota == rg) | (iota == sg) | (iota == pc)).astype(jnp.float32)

        # bias-free Linear: Cct = ct @ W^T  (w_ref holds W^T, VMEM-resident)
        cct = jnp.dot(ct, w_ref[...], preferred_element_type=jnp.float32)

        theta_ref[...] = vt_ref[...] * cct   # lane-dense store, width E
        ct_ref[...] = ct                     # lane-dense store, width ntotal

    return kernel


def cintegration_forward(vt, rgap, sgap, pcount, weight,
                         num_rgap, num_sgap, num_pcount, *, tile_n=512):
    """vt: [B, L, E] f32; rgap/sgap/pcount: [B, L] int; weight: [E, ntotal]
    f32 (PyTorch Linear.weight layout).  Returns [B, L, E + ntotal]."""
    B, L, E = vt.shape
    ntotal = num_rgap + num_sgap + num_pcount
    assert weight.shape == (E, ntotal), (weight.shape, (E, ntotal))

    N = B * L
    # clamp tile to the (8-rounded) problem size; keep it a multiple of 8.
    tile_n = _round_up(max(8, min(tile_n, _round_up(N, 8))), 8)
    Np = _round_up(N, tile_n)
    grid = Np // tile_n

    def _pad_rows(x):
        pad = Np - N
        return x if pad == 0 else jnp.pad(x, ((0, pad),) + ((0, 0),) * (x.ndim - 1))

    rg = _pad_rows(rgap.reshape(N, 1).astype(jnp.int32))
    sg = _pad_rows(sgap.reshape(N, 1).astype(jnp.int32))
    pc = _pad_rows(pcount.reshape(N, 1).astype(jnp.int32))
    vt_flat = _pad_rows(vt.reshape(N, E).astype(jnp.float32))
    w_t = jnp.asarray(weight, jnp.float32).T        # (ntotal, E)

    idx_spec = pl.BlockSpec((tile_n, 1), lambda i: (i, 0))

    # VMEM budget: double-buffered per-step tiles + resident W^T + headroom,
    # kept comfortably under v7x's 64 MiB scoped space.
    block_bytes = 4 * tile_n * (3 + 2 * E + ntotal)
    vmem_bytes = 2 * block_bytes + 4 * ntotal * E + (4 << 20)
    vmem_bytes = int(min(48 << 20, max(32 << 20, vmem_bytes)))

    theta, ct = pl.pallas_call(
        _make_kernel(num_rgap, num_sgap, num_pcount),
        out_shape=(jax.ShapeDtypeStruct((Np, E), jnp.float32),
                   jax.ShapeDtypeStruct((Np, ntotal), jnp.float32)),
        grid_spec=pltpu.PrefetchScalarGridSpec(
            num_scalar_prefetch=0,
            grid=(grid,),
            in_specs=[
                idx_spec,                                      # rgap
                idx_spec,                                      # sgap
                idx_spec,                                      # pcount
                pl.BlockSpec((tile_n, E), lambda i: (i, 0)),   # vt
                pl.BlockSpec((ntotal, E), lambda i: (0, 0)),   # W^T (resident)
            ],
            out_specs=[
                pl.BlockSpec((tile_n, E), lambda i: (i, 0)),        # theta
                pl.BlockSpec((tile_n, ntotal), lambda i: (i, 0)),   # ct
            ]),
        compiler_params=pltpu.CompilerParams(
            dimension_semantics=("parallel",),
            vmem_limit_bytes=vmem_bytes),
    )(rg, sg, pc, vt_flat, w_t)

    theta = theta[:N].reshape(B, L, E)
    ct = ct[:N].reshape(B, L, ntotal)
    return jnp.concatenate([theta, ct], axis=-1)


def _reference(vt, rgap, sgap, pcount, weight, num_rgap, num_sgap, num_pcount):
    rg = jax.nn.one_hot(rgap, num_rgap, dtype=jnp.float32)
    sg = jax.nn.one_hot(sgap, num_sgap, dtype=jnp.float32)
    pc = jax.nn.one_hot(pcount, num_pcount, dtype=jnp.float32)
    ct = jnp.concatenate([rg, sg, pc], axis=-1)
    cct = ct @ weight.T
    theta = vt * cct
    return jnp.concatenate([theta, ct], axis=-1)


if __name__ == "__main__":
    # small, deterministic config
    num_rgap, num_sgap, num_pcount = 4, 6, 8
    ntotal = num_rgap + num_sgap + num_pcount
    emb_dim = 32
    B, L = 2, 8

    key = jax.random.PRNGKey(0)
    k_vt, k_w, k_r, k_s, k_p = jax.random.split(key, 5)

    vt = jax.random.normal(k_vt, (B, L, emb_dim), dtype=jnp.float32)
    # deterministic Linear weight init (PyTorch layout: [out_features, in_features])
    weight = (jax.random.uniform(k_w, (emb_dim, ntotal), dtype=jnp.float32) - 0.5) \
             * (2.0 / np.sqrt(ntotal))
    rgap = jax.random.randint(k_r, (B, L), 0, num_rgap, dtype=jnp.int32)
    sgap = jax.random.randint(k_s, (B, L), 0, num_sgap, dtype=jnp.int32)
    pcount = jax.random.randint(k_p, (B, L), 0, num_pcount, dtype=jnp.int32)

    out = cintegration_forward(vt, rgap, sgap, pcount, weight,
                               num_rgap, num_sgap, num_pcount)
    out = jax.block_until_ready(out)

    ref = _reference(vt, rgap, sgap, pcount, weight,
                     num_rgap, num_sgap, num_pcount)
    assert out.shape == (B, L, emb_dim + ntotal)
    np.testing.assert_allclose(np.asarray(out), np.asarray(ref),
                               rtol=1e-5, atol=1e-5)
    print("KERNEL_OK")
</pallas_src>

<mosaic_0001>
module attributes {stable_mosaic.version = 11 : i64} {
  func.func @kernel(%arg0: i32, %arg1: memref<16x1xi32, #tpu.memory_space<vmem>>, %arg2: memref<16x1xi32, #tpu.memory_space<vmem>>, %arg3: memref<16x1xi32, #tpu.memory_space<vmem>>, %arg4: memref<16x32xf32, #tpu.memory_space<vmem>>, %arg5: memref<18x32xf32, #tpu.memory_space<vmem>>, %arg6: memref<16x32xf32, #tpu.memory_space<vmem>>, %arg7: memref<16x18xf32, #tpu.memory_space<vmem>>) attributes {dimension_semantics = [#tpu.dimension_semantics<parallel>], iteration_bounds = array<i64: 1>, scalar_prefetch = 0 : i64, scratch_operands = 0 : i64, tpu.core_type = #tpu.core_type<tc>, window_params = [{transform_indices = @transform_0, window_bounds = array<i64: 16, 1>}, {transform_indices = @transform_1, window_bounds = array<i64: 16, 1>}, {transform_indices = @transform_2, window_bounds = array<i64: 16, 1>}, {transform_indices = @transform_3, window_bounds = array<i64: 16, 32>}, {pipeline_mode = #tpu.pipeline_mode<synchronous>, transform_indices = @transform_4, window_bounds = array<i64: 18, 32>}, {transform_indices = @transform_5, window_bounds = array<i64: 16, 32>}, {transform_indices = @transform_6, window_bounds = array<i64: 16, 18>}]} {
    %c0 = arith.constant 0 : index
    %c0_0 = arith.constant 0 : index
    %0 = vector.load %arg1[%c0, %c0_0] : memref<16x1xi32, #tpu.memory_space<vmem>>, vector<16x1xi32>
    %c0_1 = arith.constant 0 : index
    %c0_2 = arith.constant 0 : index
    %1 = vector.load %arg2[%c0_1, %c0_2] : memref<16x1xi32, #tpu.memory_space<vmem>>, vector<16x1xi32>
    %c4_i32 = arith.constant 4 : i32
    %2 = vector.broadcast %c4_i32 : i32 to vector<16x1xi32>
    %3 = arith.addi %1, %2 : vector<16x1xi32>
    %c0_3 = arith.constant 0 : index
    %c0_4 = arith.constant 0 : index
    %4 = vector.load %arg3[%c0_3, %c0_4] : memref<16x1xi32, #tpu.memory_space<vmem>>, vector<16x1xi32>
    %c10_i32 = arith.constant 10 : i32
    %5 = vector.broadcast %c10_i32 : i32 to vector<16x1xi32>
    %6 = arith.addi %4, %5 : vector<16x1xi32>
    %7 = tpu.iota {dimensions = array<i32: 1>} : vector<16x18xi32>
    %8 = vector.broadcast %0 : vector<16x1xi32> to vector<16x18xi32>
    %9 = arith.cmpi eq, %7, %8 : vector<16x18xi32>
    %10 = vector.broadcast %3 : vector<16x1xi32> to vector<16x18xi32>
    %11 = arith.cmpi eq, %7, %10 : vector<16x18xi32>
    %12 = arith.ori %9, %11 : vector<16x18xi1>
    %13 = vector.broadcast %6 : vector<16x1xi32> to vector<16x18xi32>
    %14 = arith.cmpi eq, %7, %13 : vector<16x18xi32>
    %15 = arith.ori %12, %14 : vector<16x18xi1>
    %16 = arith.extui %15 : vector<16x18xi1> to vector<16x18xi32>
    %17 = arith.sitofp %16 : vector<16x18xi32> to vector<16x18xf32>
    %c0_5 = arith.constant 0 : index
    %c0_6 = arith.constant 0 : index
    %18 = vector.load %arg5[%c0_5, %c0_6] : memref<18x32xf32, #tpu.memory_space<vmem>>, vector<18x32xf32>
    %cst = arith.constant dense<0.000000e+00> : vector<16x32xf32>
    %19 = tpu.matmul %17, %18, %cst {dimension_numbers = #tpu.dot_dimension_numbers<[1], [0], [0], [1], [0, 0, 1, 1], [], []>} : vector<16x18xf32>, vector<18x32xf32>, vector<16x32xf32> -> vector<16x32xf32>
    %c0_7 = arith.constant 0 : index
    %c0_8 = arith.constant 0 : index
    %20 = vector.load %arg4[%c0_7, %c0_8] : memref<16x32xf32, #tpu.memory_space<vmem>>, vector<16x32xf32>
    %21 = arith.mulf %20, %19 : vector<16x32xf32>
    %c0_9 = arith.constant 0 : index
    %c0_10 = arith.constant 0 : index
    %22 = vector.load %arg6[%c0_9, %c0_10] : memref<16x32xf32, #tpu.memory_space<vmem>>, vector<16x32xf32>
    tpu.vector_store %arg6[%c0_9, %c0_10], %21 {strides = array<i32>} : memref<16x32xf32, #tpu.memory_space<vmem>>, vector<16x32xf32>,
    %c0_11 = arith.constant 0 : index
    %c0_12 = arith.constant 0 : index
    %23 = vector.load %arg7[%c0_11, %c0_12] : memref<16x18xf32, #tpu.memory_space<vmem>>, vector<16x18xf32>
    tpu.vector_store %arg7[%c0_11, %c0_12], %17 {strides = array<i32>} : memref<16x18xf32, #tpu.memory_space<vmem>>, vector<16x18xf32>,
    return
  }
  func.func @transform_0(%arg0: i32) -> (i32, i32) {
    %c0_i32 = arith.constant 0 : i32
    %c0_i32_0 = arith.constant 0 : i32
    return %arg0, %c0_i32 : i32, i32
  }
  func.func @transform_1(%arg0: i32) -> (i32, i32) {
    %c0_i32 = arith.constant 0 : i32
    %c0_i32_0 = arith.constant 0 : i32
    return %arg0, %c0_i32 : i32, i32
  }
  func.func @transform_2(%arg0: i32) -> (i32, i32) {
    %c0_i32 = arith.constant 0 : i32
    %c0_i32_0 = arith.constant 0 : i32
    return %arg0, %c0_i32 : i32, i32
  }
  func.func @transform_3(%arg0: i32) -> (i32, i32) {
    %c0_i32 = arith.constant 0 : i32
    %c0_i32_0 = arith.constant 0 : i32
    return %arg0, %c0_i32 : i32, i32
  }
  func.func @transform_4(%arg0: i32) -> (i32, i32) {
    %c0_i32 = arith.constant 0 : i32
    %c0_i32_0 = arith.constant 0 : i32
    %c0_i32_1 = arith.constant 0 : i32
    return %c0_i32, %c0_i32_0 : i32, i32
  }
  func.func @transform_5(%arg0: i32) -> (i32, i32) {
    %c0_i32 = arith.constant 0 : i32
    %c0_i32_0 = arith.constant 0 : i32
    return %arg0, %c0_i32 : i32, i32
  }
  func.func @transform_6(%arg0: i32) -> (i32, i32) {
    %c0_i32 = arith.constant 0 : i32
    %c0_i32_0 = arith.constant 0 : i32
    return %arg0, %c0_i32 : i32, i32
  }
}

</mosaic_0001>

<bundles_post_ra>
// kernel: tpu_custom_call.1
= control target key start
LH: loop header
LB: loop body
LE: loop exit
PB: predicated region body
PF: predicated region fallthrough
CT: control target
= control target key end

     0   :  { %12 = vsyncpa [#allocation3], 0  ;;  %v219_v2 = vmov 0   ;;  %s303_s0 = inlined_call_operand.vmem [shape: s32[16,1], index: 0, kind: input, shape index: {}]   ;;  %s304_s1 = inlined_call_operand.vmem [shape: s32[16,1], index: 1, kind: input, shape index: {}]   ;;  %s305_s2 = inlined_call_operand.vmem [shape: s32[16,1], index: 2, kind: input, shape index: {}]   ;;  %s306_s3 = inlined_call_operand.vmem [shape: f32[16,32], index: 3, kind: input, shape index: {}]   ;;  %s307_s4 = inlined_call_operand.vmem [shape: f32[18,32], index: 4, kind: input, shape index: {}]   ;;  %s308_s5 = inlined_call_operand.hbm [shape: f32[16,32], index: 5, kind: output, shape index: {0}]   ;;  %s309_s6 = inlined_call_operand.hbm [shape: f32[16,18], index: 6, kind: output, shape index: {1}]  }
   0x1   :  { %v24_v0 = vld [vmem:[%s303_s0] sm:$0xff]  ;;  %164 = vset.pattern.permute.xlu0 %v219_v2  ;;  %165 = vset.pattern.permute.xlu1 %v219_v2 }
   0x2   :  { %v26_v1 = vld [vmem:[%s304_s1] sm:$0xff]  ;;  %37 = vperm.xlu0 %164, %v24_v0   ;;  %166 = vset.pattern.permute.xlu2 %v219_v2 }
   0x3   :  { %v28_v3 = vadd.s32 4, %v26_v1  ;;  %v30_v4 = vld [vmem:[%s305_s2] sm:$0xff] }
   0x4   :  { %v32_v5 = vadd.s32 10, %v30_v4 }
   0x5   :  { %13 = vsyncpa [#allocation5], 0  ;;  %45 = vperm.xlu1 %165, %v28_v3   ;;  %v27_v6 = vld [vmem:[%s304_s1 + $0x8] sm:$0xff]  ;;  %v70_v11 = vld [vmem:[%s307_s4 + $0x10] sm:$0x3]  ;;  %vm78_vm0 = vcmask 1041408   ;;  %v34_v14 = vlaneseq }
   0x6   :  { %55 = vperm.xlu2 %166, %v32_v5   ;;  %v31_v7 = vld [vmem:[%s305_s2 + $0x8] sm:$0xff]  ;;  %v29_v9 = vadd.s32 4, %v27_v6  ;;  %152 = vmatpush.msk.msra.mxu0 %vm78_vm0, %v70_v11  ;;  %v68_v13 = vld [vmem:[%s307_s4] sm:$0xff]  ;;  %vm71_vm5 = vcmask 146432   ;;  %v220_v19 = vmov 0.0   ;;  %s133_s15 = sshll.u32 %s309_s6, 4  ;;  %s134_s15 = int_to_ptr.hbm [resolvable:$true] %s133_s15 }
   0x7   :  { %v25_v8 = vld [vmem:[%s303_s0 + $0x8] sm:$0xff]  ;;  %v33_v10 = vadd.s32 10, %v31_v7  ;;  %155 = vmatpush.msk.msra.mxu1 %vm78_vm0, %v70_v11  ;;  %v35_v15 = vand.u32 127, %v34_v14  ;;  %s222_s16 = smov 128   ;;  %s223_s17 = smov 8   ;;  %v105_v25 = vld [vmem:[%s306_s3] sm:$0xff] }
   0x8   :  { %v69_v12 = vld [vmem:[%s307_s4 + $0x8] sm:$0xff]  ;;  %s221_s4 = smov [#allocation4]   ;;  %vm109_vm12 = vcmask 261120   ;;  %s224_s22 = smov [#allocation2]  }
   0x9   :  { %96 = vmatpush.msra.mxu0 %v69_v12  ;;  %156 = vmatpush.msra.mxu1 %v69_v12  ;;  %s131_s12 = sshll.u32 %s221_s4, 4  ;;  %v106_v28 = vld [vmem:[%s306_s3 + $0x8] sm:$0xff]  ;;  %s118_s23 = sshll.u32 %s224_s22, 4  ;;  %s132_s12 = int_to_ptr.vmem [resolvable:$true] %s131_s12  ;;  %s119_s23 = int_to_ptr.vmem [resolvable:$true] %s118_s23 }
   0xa   :  { %40 = vperm.xlu0 %164, %v25_v8   ;;  %s120_s25 = sshll.u32 %s308_s5, 4  ;;  %s121_s25 = int_to_ptr.hbm [resolvable:$true] %s120_s25 }
   0xb   :  { %97 = vmatpush.msra.mxu0 %v68_v13  ;;  %157 = vmatpush.msra.mxu1 %v68_v13 }
   0xd   :  { %48 = vperm.xlu1 %165, %v29_v9  }
   0xe   :  { %58 = vperm.xlu2 %166, %v33_v10  }
  0x60   :  { %v56_v16 = vpop.permute.xlu2 %55 }
  0x61   :  { %vm60_vm1 = vcmp.eq.s32.totalorder %v35_v15, %v56_v16 }
  0x68   :  { %v59_v21 = vpop.permute.xlu2 %58 }
  0x69   :  { %vm61_vm9 = vcmp.eq.s32.totalorder %v35_v15, %v59_v21 }
  0x74   :  { %v38_v17 = vpop.permute.xlu0 %37 }
  0x75   :  { %vm42_vm2 = vcmp.eq.s32.totalorder %v35_v15, %v38_v17 }
  0x77   :  { %v46_v18 = vpop.permute.xlu1 %45 }
  0x78   :  { %vm50_vm3 = vcmp.eq.s32.totalorder %v35_v15, %v46_v18 }
  0x79   :  { %vm52_vm4 = vmor %vm42_vm2, %vm50_vm3 }
  0x7a   :  { %vm62_vm6 = vmor %vm52_vm4, %vm60_vm1 }
  0x7b   :  { %v150_v20 = vsel %vm62_vm6, 1.0, %v220_v19 }
  0x7c   :  { %153 = vmatmul.msk.f32.vlgmr.msra.gmra.mxu0 %vm71_vm5, %v150_v20  ;;  %112 = vst.msk [vmem:[#allocation4] sm:$0xff] %vm71_vm5, %v150_v20  ;;  %v41_v22 = vpop.permute.xlu0 %40 }
  0x7d   :  { %vm43_vm7 = vcmp.eq.s32.totalorder %v35_v15, %v41_v22 }
  0x7f   :  { %v49_v23 = vpop.permute.xlu1 %48 }
  0x80   :  { %vm51_vm8 = vcmp.eq.s32.totalorder %v35_v15, %v49_v23 }
  0x81   :  { %vm53_vm10 = vmor %vm43_vm7, %vm51_vm8 }
  0x82   :  { %vm63_vm11 = vmor %vm53_vm10, %vm61_vm9 }
  0x83   :  { %v151_v24 = vsel %vm63_vm11, 1.0, %v220_v19 }
  0x84   :  { %154 = vmatmul.msk.f32.vlgmr.msra.gmra.mxu1 %vm71_vm5, %v151_v24  ;;  %113 = vst.msk [vmem:[#allocation4 + $0x8] sm:$0xff] %vm71_vm5, %v151_v24 }
  0x85   :  { %139 = dma.vmem_to_hbm [thread:$0]  %s132_s12, 256, %s134_s15, [#allocation5], %s222_s16, %s222_s16, %s223_s17  }
  0xf9   :  { %v99_v26 = vpop.f32.mrf.mxu0 }
  0xfa   :  { %v107_v27 = vmul.f32 %v105_v25, %v99_v26 }
  0xfc   :  { %110 = vst.msk [vmem:[#allocation2] sm:$0xff] %vm109_vm12, %v107_v27 }
 0x101   :  { %v102_v29 = vpop.f32.mrf.mxu1 }
 0x102   :  { %v108_v30 = vmul.f32 %v106_v28, %v102_v29 }
 0x104   :  { %111 = vst.msk [vmem:[#allocation2 + $0x8] sm:$0xff] %vm109_vm12, %v108_v30 }
 0x105   :  { %126 = dma.vmem_to_hbm [thread:$0]  %s119_s23, 256, %s121_s25, [#allocation3], %s222_s16, %s222_s16, %s223_s17  }
 0x106   :  { %215 = dma.done.wait [#allocation3], 256  }
 0x107   :  { %216 = vsyncadd [#allocation3], 4294967040 }
 0x108   :  { %217 = dma.done.wait [#allocation5], 256  }
 0x109   :  { %218 = vsyncadd [#allocation5], 4294967040 }
 0x10a   :  { %148 = vsyncpa [#allocation3], 1 }
 0x10b   :  { %149 = vsyncpa [#allocation5], 1 }

</bundles_post_ra>
